<compile_context>
chip_gen: v5e
topology: v5e:2x2
jax: 0.10.0
libtpu: 0.0.40
codegen_flags: <defaults>
</compile_context>

<pallas_src>
import functools

import jax
import jax.numpy as jnp
from jax import lax
from jax.experimental import pallas as pl
from jax.experimental.pallas import tpu as pltpu


def _round_up(x, m):
    return (x + m - 1) // m * m


def _embed_gather_kernel(ids_ref, tab_hbm, o_ref, sem):
    # ids_ref : (M_pad,) int32 token ids, scalar-prefetched into SMEM.
    # tab_hbm : (V, E_pad) embedding table, left in HBM (memory_space=pl.ANY).
    # o_ref   : (tm, E_pad) output tile in VMEM.
    # sem     : single DMA semaphore shared by all row copies of this step.
    i = pl.program_id(0)
    tm = o_ref.shape[0]
    base = pl.multiple_of(i * tm, tm)

    # Issue every row DMA of this tile before waiting on any of them, so the
    # per-row copies (E_pad * itemsize bytes each) overlap in the DMA engine.
    def _start(r, carry):
        row = ids_ref[base + r]
        pltpu.make_async_copy(tab_hbm.at[row], o_ref.at[r], sem).start()
        return carry

    lax.fori_loop(0, tm, _start, 0, unroll=True)

    # Wait for all issued copies.  Each wait decrements the shared semaphore by
    # one row's byte count; the src slice is a dummy (only dst shape/sem matter).
    def _wait(r, carry):
        pltpu.make_async_copy(tab_hbm.at[0], o_ref.at[r], sem).wait()
        return carry

    lax.fori_loop(0, tm, _wait, 0, unroll=True)


@functools.partial(jax.jit, static_argnames=("rows_per_step",))
def share_embedding_lookup(input_sequence, embedding_table, *, rows_per_step=32):
    """out[..., :] = embedding_table[input_sequence, :]  (Share_Embedding, sinlge_word=True)."""
    V, E = embedding_table.shape
    idx_shape = input_sequence.shape
    flat_idx = input_sequence.reshape(-1).astype(jnp.int32)
    M = flat_idx.shape[0]

    # Clamp ids into range: an out-of-range id would otherwise drive an unchecked
    # OOB DMA (nn.Embedding would raise on CPU / be UB on GPU; here we clamp).
    flat_idx = jnp.clip(flat_idx, 0, V - 1)

    # Rows gathered per grid step (sublane-aligned, clamped to the padded problem).
    tm = min(rows_per_step, _round_up(M, 8))
    M_pad = _round_up(M, tm)
    # Padded ids point at row 0; their output rows are sliced away below.
    idx_pad = jnp.pad(flat_idx, (0, M_pad - M))

    # Lane-dense output: pad E to a multiple of 128 (no-op for the demo E=128).
    E_pad = _round_up(E, 128)
    tab = embedding_table
    if E_pad != E:
        tab = jnp.pad(tab, ((0, 0), (0, E_pad - E)))

    itemsize = jnp.dtype(embedding_table.dtype).itemsize
    # True traffic: gathered table rows read once + output written once + ids.
    cost = pl.CostEstimate(
        flops=0,
        transcendentals=0,
        bytes_accessed=2 * M_pad * E_pad * itemsize + M_pad * 4,
    )
    # VMEM footprint is only the double-buffered output tile; table never lands in
    # VMEM.  Keep the limit modest so it fits v7x's 64 MiB as well as v5e/v6e.
    vmem_bytes = 2 * tm * E_pad * itemsize + (4 << 20)
    vmem_bytes = int(min(max(vmem_bytes, 16 << 20), 48 << 20))

    out = pl.pallas_call(
        _embed_gather_kernel,
        out_shape=jax.ShapeDtypeStruct((M_pad, E_pad), embedding_table.dtype),
        grid_spec=pltpu.PrefetchScalarGridSpec(
            num_scalar_prefetch=1,                      # flat ids -> SMEM
            grid=(M_pad // tm,),
            in_specs=[pl.BlockSpec(memory_space=pl.ANY)],   # table stays in HBM
            out_specs=pl.BlockSpec((tm, E_pad), lambda i, ids: (i, 0)),
            scratch_shapes=[pltpu.SemaphoreType.DMA],
        ),
        compiler_params=pltpu.CompilerParams(
            dimension_semantics=("parallel",),
            vmem_limit_bytes=vmem_bytes,
        ),
        cost_estimate=cost,
    )(idx_pad, tab)

    out = out[:M, :E]
    return out.reshape(*idx_shape, E)


if __name__ == "__main__":
    key = jax.random.PRNGKey(0)
    k_idx, k_emb = jax.random.split(key)

    batch, seq = 2, 8
    vocab_size, embed_dim = 512, 128

    # nn.Embedding with weight.data.uniform_(-0.1, 0.1), mirrored deterministically.
    table = jax.random.uniform(k_emb, (vocab_size, embed_dim), jnp.float32, -0.1, 0.1)
    ids = jax.random.randint(k_idx, (batch, seq), 0, vocab_size, dtype=jnp.int32)

    out = share_embedding_lookup(ids, table)
    out = jax.block_until_ready(out)

    # Plain-JAX reference (embedding lookup).
    ref = table[ids]
    assert out.shape == (batch, seq, embed_dim)
    assert out.dtype == table.dtype
    assert jnp.allclose(out, ref, atol=1e-6, rtol=1e-6)

    print("KERNEL_OK")
</pallas_src>

<mosaic_0001>
module attributes {stable_mosaic.version = 11 : i64} {
  func.func @_embed_gather_kernel(%arg0: i32, %arg1: memref<16xi32, #tpu.memory_space<smem>>, %arg2: memref<512x128xf32, #tpu.memory_space<any>>, %arg3: memref<16x128xf32, #tpu.memory_space<vmem>>, %arg4: memref<!tpu.dma_semaphore, #tpu.memory_space<semaphore_mem>>) attributes {dimension_semantics = [#tpu.dimension_semantics<parallel>], iteration_bounds = array<i64: 1>, scalar_prefetch = 1 : i64, scratch_operands = 1 : i64, tpu.core_type = #tpu.core_type<tc>, window_params = [{}, {transform_indices = @transform_1, window_bounds = array<i64: 16, 128>}]} {
    %c16_i32 = arith.constant 16 : i32
    %0 = arith.muli %arg0, %c16_i32 : i32
    %1 = tpu.assume_multiple %0, 16 : i32
    %c0_i32 = arith.constant 0 : i32
    %2 = arith.addi %1, %c0_i32 : i32
    %3 = arith.index_cast %2 : i32 to index
    %4 = memref.load %arg1[%3] : memref<16xi32, #tpu.memory_space<smem>>
    %c0_i32_0 = arith.constant 0 : i32
    %5 = tpu.memref_slice %arg2[%4, %c0_i32_0] : memref<512x128xf32, #tpu.memory_space<any>> -> memref<1x128xf32, #tpu.memory_space<any>>
    %6 = tpu.memref_squeeze %5 : memref<1x128xf32, #tpu.memory_space<any>> -> memref<128xf32, #tpu.memory_space<any>>
    %c0_i32_1 = arith.constant 0 : i32
    %7 = tpu.memref_slice %arg3[%c0_i32, %c0_i32_1] : memref<16x128xf32, #tpu.memory_space<vmem>> -> memref<1x128xf32, #tpu.memory_space<vmem>>
    %8 = tpu.memref_squeeze %7 : memref<1x128xf32, #tpu.memory_space<vmem>> -> memref<128xf32, #tpu.memory_space<vmem>>
    tpu.enqueue_dma source(%6 : memref<128xf32, #tpu.memory_space<any>>) target(%8 : memref<128xf32, #tpu.memory_space<vmem>>) target_semaphore(%arg4 : memref<!tpu.dma_semaphore, #tpu.memory_space<semaphore_mem>>)
    %c1_i32 = arith.constant 1 : i32
    %9 = arith.addi %1, %c1_i32 : i32
    %10 = arith.index_cast %9 : i32 to index
    %11 = memref.load %arg1[%10] : memref<16xi32, #tpu.memory_space<smem>>
    %c0_i32_2 = arith.constant 0 : i32
    %12 = tpu.memref_slice %arg2[%11, %c0_i32_2] : memref<512x128xf32, #tpu.memory_space<any>> -> memref<1x128xf32, #tpu.memory_space<any>>
    %13 = tpu.memref_squeeze %12 : memref<1x128xf32, #tpu.memory_space<any>> -> memref<128xf32, #tpu.memory_space<any>>
    %c0_i32_3 = arith.constant 0 : i32
    %14 = tpu.memref_slice %arg3[%c1_i32, %c0_i32_3] : memref<16x128xf32, #tpu.memory_space<vmem>> -> memref<1x128xf32, #tpu.memory_space<vmem>>
    %15 = tpu.memref_squeeze %14 : memref<1x128xf32, #tpu.memory_space<vmem>> -> memref<128xf32, #tpu.memory_space<vmem>>
    tpu.enqueue_dma source(%13 : memref<128xf32, #tpu.memory_space<any>>) target(%15 : memref<128xf32, #tpu.memory_space<vmem>>) target_semaphore(%arg4 : memref<!tpu.dma_semaphore, #tpu.memory_space<semaphore_mem>>)
    %c2_i32 = arith.constant 2 : i32
    %16 = arith.addi %1, %c2_i32 : i32
    %17 = arith.index_cast %16 : i32 to index
    %18 = memref.load %arg1[%17] : memref<16xi32, #tpu.memory_space<smem>>
    %c0_i32_4 = arith.constant 0 : i32
    %19 = tpu.memref_slice %arg2[%18, %c0_i32_4] : memref<512x128xf32, #tpu.memory_space<any>> -> memref<1x128xf32, #tpu.memory_space<any>>
    %20 = tpu.memref_squeeze %19 : memref<1x128xf32, #tpu.memory_space<any>> -> memref<128xf32, #tpu.memory_space<any>>
    %c0_i32_5 = arith.constant 0 : i32
    %21 = tpu.memref_slice %arg3[%c2_i32, %c0_i32_5] : memref<16x128xf32, #tpu.memory_space<vmem>> -> memref<1x128xf32, #tpu.memory_space<vmem>>
    %22 = tpu.memref_squeeze %21 : memref<1x128xf32, #tpu.memory_space<vmem>> -> memref<128xf32, #tpu.memory_space<vmem>>
    tpu.enqueue_dma source(%20 : memref<128xf32, #tpu.memory_space<any>>) target(%22 : memref<128xf32, #tpu.memory_space<vmem>>) target_semaphore(%arg4 : memref<!tpu.dma_semaphore, #tpu.memory_space<semaphore_mem>>)
    %c3_i32 = arith.constant 3 : i32
    %23 = arith.addi %1, %c3_i32 : i32
    %24 = arith.index_cast %23 : i32 to index
    %25 = memref.load %arg1[%24] : memref<16xi32, #tpu.memory_space<smem>>
    %c0_i32_6 = arith.constant 0 : i32
    %26 = tpu.memref_slice %arg2[%25, %c0_i32_6] : memref<512x128xf32, #tpu.memory_space<any>> -> memref<1x128xf32, #tpu.memory_space<any>>
    %27 = tpu.memref_squeeze %26 : memref<1x128xf32, #tpu.memory_space<any>> -> memref<128xf32, #tpu.memory_space<any>>
    %c0_i32_7 = arith.constant 0 : i32
    %28 = tpu.memref_slice %arg3[%c3_i32, %c0_i32_7] : memref<16x128xf32, #tpu.memory_space<vmem>> -> memref<1x128xf32, #tpu.memory_space<vmem>>
    %29 = tpu.memref_squeeze %28 : memref<1x128xf32, #tpu.memory_space<vmem>> -> memref<128xf32, #tpu.memory_space<vmem>>
    tpu.enqueue_dma source(%27 : memref<128xf32, #tpu.memory_space<any>>) target(%29 : memref<128xf32, #tpu.memory_space<vmem>>) target_semaphore(%arg4 : memref<!tpu.dma_semaphore, #tpu.memory_space<semaphore_mem>>)
    %c4_i32 = arith.constant 4 : i32
    %30 = arith.addi %1, %c4_i32 : i32
    %31 = arith.index_cast %30 : i32 to index
    %32 = memref.load %arg1[%31] : memref<16xi32, #tpu.memory_space<smem>>
    %c0_i32_8 = arith.constant 0 : i32
    %33 = tpu.memref_slice %arg2[%32, %c0_i32_8] : memref<512x128xf32, #tpu.memory_space<any>> -> memref<1x128xf32, #tpu.memory_space<any>>
    %34 = tpu.memref_squeeze %33 : memref<1x128xf32, #tpu.memory_space<any>> -> memref<128xf32, #tpu.memory_space<any>>
    %c0_i32_9 = arith.constant 0 : i32
    %35 = tpu.memref_slice %arg3[%c4_i32, %c0_i32_9] : memref<16x128xf32, #tpu.memory_space<vmem>> -> memref<1x128xf32, #tpu.memory_space<vmem>>
    %36 = tpu.memref_squeeze %35 : memref<1x128xf32, #tpu.memory_space<vmem>> -> memref<128xf32, #tpu.memory_space<vmem>>
    tpu.enqueue_dma source(%34 : memref<128xf32, #tpu.memory_space<any>>) target(%36 : memref<128xf32, #tpu.memory_space<vmem>>) target_semaphore(%arg4 : memref<!tpu.dma_semaphore, #tpu.memory_space<semaphore_mem>>)
    %c5_i32 = arith.constant 5 : i32
    %37 = arith.addi %1, %c5_i32 : i32
    %38 = arith.index_cast %37 : i32 to index
    %39 = memref.load %arg1[%38] : memref<16xi32, #tpu.memory_space<smem>>
    %c0_i32_10 = arith.constant 0 : i32
    %40 = tpu.memref_slice %arg2[%39, %c0_i32_10] : memref<512x128xf32, #tpu.memory_space<any>> -> memref<1x128xf32, #tpu.memory_space<any>>
    %41 = tpu.memref_squeeze %40 : memref<1x128xf32, #tpu.memory_space<any>> -> memref<128xf32, #tpu.memory_space<any>>
    %c0_i32_11 = arith.constant 0 : i32
    %42 = tpu.memref_slice %arg3[%c5_i32, %c0_i32_11] : memref<16x128xf32, #tpu.memory_space<vmem>> -> memref<1x128xf32, #tpu.memory_space<vmem>>
    %43 = tpu.memref_squeeze %42 : memref<1x128xf32, #tpu.memory_space<vmem>> -> memref<128xf32, #tpu.memory_space<vmem>>
    tpu.enqueue_dma source(%41 : memref<128xf32, #tpu.memory_space<any>>) target(%43 : memref<128xf32, #tpu.memory_space<vmem>>) target_semaphore(%arg4 : memref<!tpu.dma_semaphore, #tpu.memory_space<semaphore_mem>>)
    %c6_i32 = arith.constant 6 : i32
    %44 = arith.addi %1, %c6_i32 : i32
    %45 = arith.index_cast %44 : i32 to index
    %46 = memref.load %arg1[%45] : memref<16xi32, #tpu.memory_space<smem>>
    %c0_i32_12 = arith.constant 0 : i32
    %47 = tpu.memref_slice %arg2[%46, %c0_i32_12] : memref<512x128xf32, #tpu.memory_space<any>> -> memref<1x128xf32, #tpu.memory_space<any>>
    %48 = tpu.memref_squeeze %47 : memref<1x128xf32, #tpu.memory_space<any>> -> memref<128xf32, #tpu.memory_space<any>>
    %c0_i32_13 = arith.constant 0 : i32
    %49 = tpu.memref_slice %arg3[%c6_i32, %c0_i32_13] : memref<16x128xf32, #tpu.memory_space<vmem>> -> memref<1x128xf32, #tpu.memory_space<vmem>>
    %50 = tpu.memref_squeeze %49 : memref<1x128xf32, #tpu.memory_space<vmem>> -> memref<128xf32, #tpu.memory_space<vmem>>
    tpu.enqueue_dma source(%48 : memref<128xf32, #tpu.memory_space<any>>) target(%50 : memref<128xf32, #tpu.memory_space<vmem>>) target_semaphore(%arg4 : memref<!tpu.dma_semaphore, #tpu.memory_space<semaphore_mem>>)
    %c7_i32 = arith.constant 7 : i32
    %51 = arith.addi %1, %c7_i32 : i32
    %52 = arith.index_cast %51 : i32 to index
    %53 = memref.load %arg1[%52] : memref<16xi32, #tpu.memory_space<smem>>
    %c0_i32_14 = arith.constant 0 : i32
    %54 = tpu.memref_slice %arg2[%53, %c0_i32_14] : memref<512x128xf32, #tpu.memory_space<any>> -> memref<1x128xf32, #tpu.memory_space<any>>
    %55 = tpu.memref_squeeze %54 : memref<1x128xf32, #tpu.memory_space<any>> -> memref<128xf32, #tpu.memory_space<any>>
    %c0_i32_15 = arith.constant 0 : i32
    %56 = tpu.memref_slice %arg3[%c7_i32, %c0_i32_15] : memref<16x128xf32, #tpu.memory_space<vmem>> -> memref<1x128xf32, #tpu.memory_space<vmem>>
    %57 = tpu.memref_squeeze %56 : memref<1x128xf32, #tpu.memory_space<vmem>> -> memref<128xf32, #tpu.memory_space<vmem>>
    tpu.enqueue_dma source(%55 : memref<128xf32, #tpu.memory_space<any>>) target(%57 : memref<128xf32, #tpu.memory_space<vmem>>) target_semaphore(%arg4 : memref<!tpu.dma_semaphore, #tpu.memory_space<semaphore_mem>>)
    %c8_i32 = arith.constant 8 : i32
    %58 = arith.addi %1, %c8_i32 : i32
    %59 = arith.index_cast %58 : i32 to index
    %60 = memref.load %arg1[%59] : memref<16xi32, #tpu.memory_space<smem>>
    %c0_i32_16 = arith.constant 0 : i32
    %61 = tpu.memref_slice %arg2[%60, %c0_i32_16] : memref<512x128xf32, #tpu.memory_space<any>> -> memref<1x128xf32, #tpu.memory_space<any>>
    %62 = tpu.memref_squeeze %61 : memref<1x128xf32, #tpu.memory_space<any>> -> memref<128xf32, #tpu.memory_space<any>>
    %c0_i32_17 = arith.constant 0 : i32
    %63 = tpu.memref_slice %arg3[%c8_i32, %c0_i32_17] : memref<16x128xf32, #tpu.memory_space<vmem>> -> memref<1x128xf32, #tpu.memory_space<vmem>>
    %64 = tpu.memref_squeeze %63 : memref<1x128xf32, #tpu.memory_space<vmem>> -> memref<128xf32, #tpu.memory_space<vmem>>
    tpu.enqueue_dma source(%62 : memref<128xf32, #tpu.memory_space<any>>) target(%64 : memref<128xf32, #tpu.memory_space<vmem>>) target_semaphore(%arg4 : memref<!tpu.dma_semaphore, #tpu.memory_space<semaphore_mem>>)
    %c9_i32 = arith.constant 9 : i32
    %65 = arith.addi %1, %c9_i32 : i32
    %66 = arith.index_cast %65 : i32 to index
    %67 = memref.load %arg1[%66] : memref<16xi32, #tpu.memory_space<smem>>
    %c0_i32_18 = arith.constant 0 : i32
    %68 = tpu.memref_slice %arg2[%67, %c0_i32_18] : memref<512x128xf32, #tpu.memory_space<any>> -> memref<1x128xf32, #tpu.memory_space<any>>
    %69 = tpu.memref_squeeze %68 : memref<1x128xf32, #tpu.memory_space<any>> -> memref<128xf32, #tpu.memory_space<any>>
    %c0_i32_19 = arith.constant 0 : i32
    %70 = tpu.memref_slice %arg3[%c9_i32, %c0_i32_19] : memref<16x128xf32, #tpu.memory_space<vmem>> -> memref<1x128xf32, #tpu.memory_space<vmem>>
    %71 = tpu.memref_squeeze %70 : memref<1x128xf32, #tpu.memory_space<vmem>> -> memref<128xf32, #tpu.memory_space<vmem>>
    tpu.enqueue_dma source(%69 : memref<128xf32, #tpu.memory_space<any>>) target(%71 : memref<128xf32, #tpu.memory_space<vmem>>) target_semaphore(%arg4 : memref<!tpu.dma_semaphore, #tpu.memory_space<semaphore_mem>>)
    %c10_i32 = arith.constant 10 : i32
    %72 = arith.addi %1, %c10_i32 : i32
    %73 = arith.index_cast %72 : i32 to index
    %74 = memref.load %arg1[%73] : memref<16xi32, #tpu.memory_space<smem>>
    %c0_i32_20 = arith.constant 0 : i32
    %75 = tpu.memref_slice %arg2[%74, %c0_i32_20] : memref<512x128xf32, #tpu.memory_space<any>> -> memref<1x128xf32, #tpu.memory_space<any>>
    %76 = tpu.memref_squeeze %75 : memref<1x128xf32, #tpu.memory_space<any>> -> memref<128xf32, #tpu.memory_space<any>>
    %c0_i32_21 = arith.constant 0 : i32
    %77 = tpu.memref_slice %arg3[%c10_i32, %c0_i32_21] : memref<16x128xf32, #tpu.memory_space<vmem>> -> memref<1x128xf32, #tpu.memory_space<vmem>>
    %78 = tpu.memref_squeeze %77 : memref<1x128xf32, #tpu.memory_space<vmem>> -> memref<128xf32, #tpu.memory_space<vmem>>
    tpu.enqueue_dma source(%76 : memref<128xf32, #tpu.memory_space<any>>) target(%78 : memref<128xf32, #tpu.memory_space<vmem>>) target_semaphore(%arg4 : memref<!tpu.dma_semaphore, #tpu.memory_space<semaphore_mem>>)
    %c11_i32 = arith.constant 11 : i32
    %79 = arith.addi %1, %c11_i32 : i32
    %80 = arith.index_cast %79 : i32 to index
    %81 = memref.load %arg1[%80] : memref<16xi32, #tpu.memory_space<smem>>
    %c0_i32_22 = arith.constant 0 : i32
    %82 = tpu.memref_slice %arg2[%81, %c0_i32_22] : memref<512x128xf32, #tpu.memory_space<any>> -> memref<1x128xf32, #tpu.memory_space<any>>
    %83 = tpu.memref_squeeze %82 : memref<1x128xf32, #tpu.memory_space<any>> -> memref<128xf32, #tpu.memory_space<any>>
    %c0_i32_23 = arith.constant 0 : i32
    %84 = tpu.memref_slice %arg3[%c11_i32, %c0_i32_23] : memref<16x128xf32, #tpu.memory_space<vmem>> -> memref<1x128xf32, #tpu.memory_space<vmem>>
    %85 = tpu.memref_squeeze %84 : memref<1x128xf32, #tpu.memory_space<vmem>> -> memref<128xf32, #tpu.memory_space<vmem>>
    tpu.enqueue_dma source(%83 : memref<128xf32, #tpu.memory_space<any>>) target(%85 : memref<128xf32, #tpu.memory_space<vmem>>) target_semaphore(%arg4 : memref<!tpu.dma_semaphore, #tpu.memory_space<semaphore_mem>>)
    %c12_i32 = arith.constant 12 : i32
    %86 = arith.addi %1, %c12_i32 : i32
    %87 = arith.index_cast %86 : i32 to index
    %88 = memref.load %arg1[%87] : memref<16xi32, #tpu.memory_space<smem>>
    %c0_i32_24 = arith.constant 0 : i32
    %89 = tpu.memref_slice %arg2[%88, %c0_i32_24] : memref<512x128xf32, #tpu.memory_space<any>> -> memref<1x128xf32, #tpu.memory_space<any>>
    %90 = tpu.memref_squeeze %89 : memref<1x128xf32, #tpu.memory_space<any>> -> memref<128xf32, #tpu.memory_space<any>>
    %c0_i32_25 = arith.constant 0 : i32
    %91 = tpu.memref_slice %arg3[%c12_i32, %c0_i32_25] : memref<16x128xf32, #tpu.memory_space<vmem>> -> memref<1x128xf32, #tpu.memory_space<vmem>>
    %92 = tpu.memref_squeeze %91 : memref<1x128xf32, #tpu.memory_space<vmem>> -> memref<128xf32, #tpu.memory_space<vmem>>
    tpu.enqueue_dma source(%90 : memref<128xf32, #tpu.memory_space<any>>) target(%92 : memref<128xf32, #tpu.memory_space<vmem>>) target_semaphore(%arg4 : memref<!tpu.dma_semaphore, #tpu.memory_space<semaphore_mem>>)
    %c13_i32 = arith.constant 13 : i32
    %93 = arith.addi %1, %c13_i32 : i32
    %94 = arith.index_cast %93 : i32 to index
    %95 = memref.load %arg1[%94] : memref<16xi32, #tpu.memory_space<smem>>
    %c0_i32_26 = arith.constant 0 : i32
    %96 = tpu.memref_slice %arg2[%95, %c0_i32_26] : memref<512x128xf32, #tpu.memory_space<any>> -> memref<1x128xf32, #tpu.memory_space<any>>
    %97 = tpu.memref_squeeze %96 : memref<1x128xf32, #tpu.memory_space<any>> -> memref<128xf32, #tpu.memory_space<any>>
    %c0_i32_27 = arith.constant 0 : i32
    %98 = tpu.memref_slice %arg3[%c13_i32, %c0_i32_27] : memref<16x128xf32, #tpu.memory_space<vmem>> -> memref<1x128xf32, #tpu.memory_space<vmem>>
    %99 = tpu.memref_squeeze %98 : memref<1x128xf32, #tpu.memory_space<vmem>> -> memref<128xf32, #tpu.memory_space<vmem>>
    tpu.enqueue_dma source(%97 : memref<128xf32, #tpu.memory_space<any>>) target(%99 : memref<128xf32, #tpu.memory_space<vmem>>) target_semaphore(%arg4 : memref<!tpu.dma_semaphore, #tpu.memory_space<semaphore_mem>>)
    %c14_i32 = arith.constant 14 : i32
    %100 = arith.addi %1, %c14_i32 : i32
    %101 = arith.index_cast %100 : i32 to index
    %102 = memref.load %arg1[%101] : memref<16xi32, #tpu.memory_space<smem>>
    %c0_i32_28 = arith.constant 0 : i32
    %103 = tpu.memref_slice %arg2[%102, %c0_i32_28] : memref<512x128xf32, #tpu.memory_space<any>> -> memref<1x128xf32, #tpu.memory_space<any>>
    %104 = tpu.memref_squeeze %103 : memref<1x128xf32, #tpu.memory_space<any>> -> memref<128xf32, #tpu.memory_space<any>>
    %c0_i32_29 = arith.constant 0 : i32
    %105 = tpu.memref_slice %arg3[%c14_i32, %c0_i32_29] : memref<16x128xf32, #tpu.memory_space<vmem>> -> memref<1x128xf32, #tpu.memory_space<vmem>>
    %106 = tpu.memref_squeeze %105 : memref<1x128xf32, #tpu.memory_space<vmem>> -> memref<128xf32, #tpu.memory_space<vmem>>
    tpu.enqueue_dma source(%104 : memref<128xf32, #tpu.memory_space<any>>) target(%106 : memref<128xf32, #tpu.memory_space<vmem>>) target_semaphore(%arg4 : memref<!tpu.dma_semaphore, #tpu.memory_space<semaphore_mem>>)
    %c15_i32 = arith.constant 15 : i32
    %107 = arith.addi %1, %c15_i32 : i32
    %108 = arith.index_cast %107 : i32 to index
    %109 = memref.load %arg1[%108] : memref<16xi32, #tpu.memory_space<smem>>
    %c0_i32_30 = arith.constant 0 : i32
    %110 = tpu.memref_slice %arg2[%109, %c0_i32_30] : memref<512x128xf32, #tpu.memory_space<any>> -> memref<1x128xf32, #tpu.memory_space<any>>
    %111 = tpu.memref_squeeze %110 : memref<1x128xf32, #tpu.memory_space<any>> -> memref<128xf32, #tpu.memory_space<any>>
    %c0_i32_31 = arith.constant 0 : i32
    %112 = tpu.memref_slice %arg3[%c15_i32, %c0_i32_31] : memref<16x128xf32, #tpu.memory_space<vmem>> -> memref<1x128xf32, #tpu.memory_space<vmem>>
    %113 = tpu.memref_squeeze %112 : memref<1x128xf32, #tpu.memory_space<vmem>> -> memref<128xf32, #tpu.memory_space<vmem>>
    tpu.enqueue_dma source(%111 : memref<128xf32, #tpu.memory_space<any>>) target(%113 : memref<128xf32, #tpu.memory_space<vmem>>) target_semaphore(%arg4 : memref<!tpu.dma_semaphore, #tpu.memory_space<semaphore_mem>>)
    %c16_i32_32 = arith.constant 16 : i32
    %c0_i32_33 = arith.constant 0 : i32
    %c0_i32_34 = arith.constant 0 : i32
    %c0_i32_35 = arith.constant 0 : i32
    %114 = tpu.memref_slice %arg2[%c0_i32_34, %c0_i32_35] : memref<512x128xf32, #tpu.memory_space<any>> -> memref<1x128xf32, #tpu.memory_space<any>>
    %115 = tpu.memref_squeeze %114 : memref<1x128xf32, #tpu.memory_space<any>> -> memref<128xf32, #tpu.memory_space<any>>
    %c0_i32_36 = arith.constant 0 : i32
    %116 = tpu.memref_slice %arg3[%c0_i32_33, %c0_i32_36] : memref<16x128xf32, #tpu.memory_space<vmem>> -> memref<1x128xf32, #tpu.memory_space<vmem>>
    %117 = tpu.memref_squeeze %116 : memref<1x128xf32, #tpu.memory_space<vmem>> -> memref<128xf32, #tpu.memory_space<vmem>>
    tpu.wait_dma2 semaphore(%arg4 : memref<!tpu.dma_semaphore, #tpu.memory_space<semaphore_mem>>) src(%115 : memref<128xf32, #tpu.memory_space<any>>) dst(%117 : memref<128xf32, #tpu.memory_space<vmem>>)
    %c1_i32_37 = arith.constant 1 : i32
    %c0_i32_38 = arith.constant 0 : i32
    %c0_i32_39 = arith.constant 0 : i32
    %118 = tpu.memref_slice %arg2[%c0_i32_38, %c0_i32_39] : memref<512x128xf32, #tpu.memory_space<any>> -> memref<1x128xf32, #tpu.memory_space<any>>
    %119 = tpu.memref_squeeze %118 : memref<1x128xf32, #tpu.memory_space<any>> -> memref<128xf32, #tpu.memory_space<any>>
    %c0_i32_40 = arith.constant 0 : i32
    %120 = tpu.memref_slice %arg3[%c1_i32_37, %c0_i32_40] : memref<16x128xf32, #tpu.memory_space<vmem>> -> memref<1x128xf32, #tpu.memory_space<vmem>>
    %121 = tpu.memref_squeeze %120 : memref<1x128xf32, #tpu.memory_space<vmem>> -> memref<128xf32, #tpu.memory_space<vmem>>
    tpu.wait_dma2 semaphore(%arg4 : memref<!tpu.dma_semaphore, #tpu.memory_space<semaphore_mem>>) src(%119 : memref<128xf32, #tpu.memory_space<any>>) dst(%121 : memref<128xf32, #tpu.memory_space<vmem>>)
    %c2_i32_41 = arith.constant 2 : i32
    %c0_i32_42 = arith.constant 0 : i32
    %c0_i32_43 = arith.constant 0 : i32
    %122 = tpu.memref_slice %arg2[%c0_i32_42, %c0_i32_43] : memref<512x128xf32, #tpu.memory_space<any>> -> memref<1x128xf32, #tpu.memory_space<any>>
    %123 = tpu.memref_squeeze %122 : memref<1x128xf32, #tpu.memory_space<any>> -> memref<128xf32, #tpu.memory_space<any>>
    %c0_i32_44 = arith.constant 0 : i32
    %124 = tpu.memref_slice %arg3[%c2_i32_41, %c0_i32_44] : memref<16x128xf32, #tpu.memory_space<vmem>> -> memref<1x128xf32, #tpu.memory_space<vmem>>
    %125 = tpu.memref_squeeze %124 : memref<1x128xf32, #tpu.memory_space<vmem>> -> memref<128xf32, #tpu.memory_space<vmem>>
    tpu.wait_dma2 semaphore(%arg4 : memref<!tpu.dma_semaphore, #tpu.memory_space<semaphore_mem>>) src(%123 : memref<128xf32, #tpu.memory_space<any>>) dst(%125 : memref<128xf32, #tpu.memory_space<vmem>>)
    %c3_i32_45 = arith.constant 3 : i32
    %c0_i32_46 = arith.constant 0 : i32
    %c0_i32_47 = arith.constant 0 : i32
    %126 = tpu.memref_slice %arg2[%c0_i32_46, %c0_i32_47] : memref<512x128xf32, #tpu.memory_space<any>> -> memref<1x128xf32, #tpu.memory_space<any>>
    %127 = tpu.memref_squeeze %126 : memref<1x128xf32, #tpu.memory_space<any>> -> memref<128xf32, #tpu.memory_space<any>>
    %c0_i32_48 = arith.constant 0 : i32
    %128 = tpu.memref_slice %arg3[%c3_i32_45, %c0_i32_48] : memref<16x128xf32, #tpu.memory_space<vmem>> -> memref<1x128xf32, #tpu.memory_space<vmem>>
    %129 = tpu.memref_squeeze %128 : memref<1x128xf32, #tpu.memory_space<vmem>> -> memref<128xf32, #tpu.memory_space<vmem>>
    tpu.wait_dma2 semaphore(%arg4 : memref<!tpu.dma_semaphore, #tpu.memory_space<semaphore_mem>>) src(%127 : memref<128xf32, #tpu.memory_space<any>>) dst(%129 : memref<128xf32, #tpu.memory_space<vmem>>)
    %c4_i32_49 = arith.constant 4 : i32
    %c0_i32_50 = arith.constant 0 : i32
    %c0_i32_51 = arith.constant 0 : i32
    %130 = tpu.memref_slice %arg2[%c0_i32_50, %c0_i32_51] : memref<512x128xf32, #tpu.memory_space<any>> -> memref<1x128xf32, #tpu.memory_space<any>>
    %131 = tpu.memref_squeeze %130 : memref<1x128xf32, #tpu.memory_space<any>> -> memref<128xf32, #tpu.memory_space<any>>
    %c0_i32_52 = arith.constant 0 : i32
    %132 = tpu.memref_slice %arg3[%c4_i32_49, %c0_i32_52] : memref<16x128xf32, #tpu.memory_space<vmem>> -> memref<1x128xf32, #tpu.memory_space<vmem>>
    %133 = tpu.memref_squeeze %132 : memref<1x128xf32, #tpu.memory_space<vmem>> -> memref<128xf32, #tpu.memory_space<vmem>>
    tpu.wait_dma2 semaphore(%arg4 : memref<!tpu.dma_semaphore, #tpu.memory_space<semaphore_mem>>) src(%131 : memref<128xf32, #tpu.memory_space<any>>) dst(%133 : memref<128xf32, #tpu.memory_space<vmem>>)
    %c5_i32_53 = arith.constant 5 : i32
    %c0_i32_54 = arith.constant 0 : i32
    %c0_i32_55 = arith.constant 0 : i32
    %134 = tpu.memref_slice %arg2[%c0_i32_54, %c0_i32_55] : memref<512x128xf32, #tpu.memory_space<any>> -> memref<1x128xf32, #tpu.memory_space<any>>
    %135 = tpu.memref_squeeze %134 : memref<1x128xf32, #tpu.memory_space<any>> -> memref<128xf32, #tpu.memory_space<any>>
    %c0_i32_56 = arith.constant 0 : i32
    %136 = tpu.memref_slice %arg3[%c5_i32_53, %c0_i32_56] : memref<16x128xf32, #tpu.memory_space<vmem>> -> memref<1x128xf32, #tpu.memory_space<vmem>>
    %137 = tpu.memref_squeeze %136 : memref<1x128xf32, #tpu.memory_space<vmem>> -> memref<128xf32, #tpu.memory_space<vmem>>
    tpu.wait_dma2 semaphore(%arg4 : memref<!tpu.dma_semaphore, #tpu.memory_space<semaphore_mem>>) src(%135 : memref<128xf32, #tpu.memory_space<any>>) dst(%137 : memref<128xf32, #tpu.memory_space<vmem>>)
    %c6_i32_57 = arith.constant 6 : i32
    %c0_i32_58 = arith.constant 0 : i32
    %c0_i32_59 = arith.constant 0 : i32
    %138 = tpu.memref_slice %arg2[%c0_i32_58, %c0_i32_59] : memref<512x128xf32, #tpu.memory_space<any>> -> memref<1x128xf32, #tpu.memory_space<any>>
    %139 = tpu.memref_squeeze %138 : memref<1x128xf32, #tpu.memory_space<any>> -> memref<128xf32, #tpu.memory_space<any>>
    %c0_i32_60 = arith.constant 0 : i32
    %140 = tpu.memref_slice %arg3[%c6_i32_57, %c0_i32_60] : memref<16x128xf32, #tpu.memory_space<vmem>> -> memref<1x128xf32, #tpu.memory_space<vmem>>
    %141 = tpu.memref_squeeze %140 : memref<1x128xf32, #tpu.memory_space<vmem>> -> memref<128xf32, #tpu.memory_space<vmem>>
    tpu.wait_dma2 semaphore(%arg4 : memref<!tpu.dma_semaphore, #tpu.memory_space<semaphore_mem>>) src(%139 : memref<128xf32, #tpu.memory_space<any>>) dst(%141 : memref<128xf32, #tpu.memory_space<vmem>>)
    %c7_i32_61 = arith.constant 7 : i32
    %c0_i32_62 = arith.constant 0 : i32
    %c0_i32_63 = arith.constant 0 : i32
    %142 = tpu.memref_slice %arg2[%c0_i32_62, %c0_i32_63] : memref<512x128xf32, #tpu.memory_space<any>> -> memref<1x128xf32, #tpu.memory_space<any>>
    %143 = tpu.memref_squeeze %142 : memref<1x128xf32, #tpu.memory_space<any>> -> memref<128xf32, #tpu.memory_space<any>>
    %c0_i32_64 = arith.constant 0 : i32
    %144 = tpu.memref_slice %arg3[%c7_i32_61, %c0_i32_64] : memref<16x128xf32, #tpu.memory_space<vmem>> -> memref<1x128xf32, #tpu.memory_space<vmem>>
    %145 = tpu.memref_squeeze %144 : memref<1x128xf32, #tpu.memory_space<vmem>> -> memref<128xf32, #tpu.memory_space<vmem>>
    tpu.wait_dma2 semaphore(%arg4 : memref<!tpu.dma_semaphore, #tpu.memory_space<semaphore_mem>>) src(%143 : memref<128xf32, #tpu.memory_space<any>>) dst(%145 : memref<128xf32, #tpu.memory_space<vmem>>)
    %c8_i32_65 = arith.constant 8 : i32
    %c0_i32_66 = arith.constant 0 : i32
    %c0_i32_67 = arith.constant 0 : i32
    %146 = tpu.memref_slice %arg2[%c0_i32_66, %c0_i32_67] : memref<512x128xf32, #tpu.memory_space<any>> -> memref<1x128xf32, #tpu.memory_space<any>>
    %147 = tpu.memref_squeeze %146 : memref<1x128xf32, #tpu.memory_space<any>> -> memref<128xf32, #tpu.memory_space<any>>
    %c0_i32_68 = arith.constant 0 : i32
    %148 = tpu.memref_slice %arg3[%c8_i32_65, %c0_i32_68] : memref<16x128xf32, #tpu.memory_space<vmem>> -> memref<1x128xf32, #tpu.memory_space<vmem>>
    %149 = tpu.memref_squeeze %148 : memref<1x128xf32, #tpu.memory_space<vmem>> -> memref<128xf32, #tpu.memory_space<vmem>>
    tpu.wait_dma2 semaphore(%arg4 : memref<!tpu.dma_semaphore, #tpu.memory_space<semaphore_mem>>) src(%147 : memref<128xf32, #tpu.memory_space<any>>) dst(%149 : memref<128xf32, #tpu.memory_space<vmem>>)
    %c9_i32_69 = arith.constant 9 : i32
    %c0_i32_70 = arith.constant 0 : i32
    %c0_i32_71 = arith.constant 0 : i32
    %150 = tpu.memref_slice %arg2[%c0_i32_70, %c0_i32_71] : memref<512x128xf32, #tpu.memory_space<any>> -> memref<1x128xf32, #tpu.memory_space<any>>
    %151 = tpu.memref_squeeze %150 : memref<1x128xf32, #tpu.memory_space<any>> -> memref<128xf32, #tpu.memory_space<any>>
    %c0_i32_72 = arith.constant 0 : i32
    %152 = tpu.memref_slice %arg3[%c9_i32_69, %c0_i32_72] : memref<16x128xf32, #tpu.memory_space<vmem>> -> memref<1x128xf32, #tpu.memory_space<vmem>>
    %153 = tpu.memref_squeeze %152 : memref<1x128xf32, #tpu.memory_space<vmem>> -> memref<128xf32, #tpu.memory_space<vmem>>
    tpu.wait_dma2 semaphore(%arg4 : memref<!tpu.dma_semaphore, #tpu.memory_space<semaphore_mem>>) src(%151 : memref<128xf32, #tpu.memory_space<any>>) dst(%153 : memref<128xf32, #tpu.memory_space<vmem>>)
    %c10_i32_73 = arith.constant 10 : i32
    %c0_i32_74 = arith.constant 0 : i32
    %c0_i32_75 = arith.constant 0 : i32
    %154 = tpu.memref_slice %arg2[%c0_i32_74, %c0_i32_75] : memref<512x128xf32, #tpu.memory_space<any>> -> memref<1x128xf32, #tpu.memory_space<any>>
    %155 = tpu.memref_squeeze %154 : memref<1x128xf32, #tpu.memory_space<any>> -> memref<128xf32, #tpu.memory_space<any>>
    %c0_i32_76 = arith.constant 0 : i32
    %156 = tpu.memref_slice %arg3[%c10_i32_73, %c0_i32_76] : memref<16x128xf32, #tpu.memory_space<vmem>> -> memref<1x128xf32, #tpu.memory_space<vmem>>
    %157 = tpu.memref_squeeze %156 : memref<1x128xf32, #tpu.memory_space<vmem>> -> memref<128xf32, #tpu.memory_space<vmem>>
    tpu.wait_dma2 semaphore(%arg4 : memref<!tpu.dma_semaphore, #tpu.memory_space<semaphore_mem>>) src(%155 : memref<128xf32, #tpu.memory_space<any>>) dst(%157 : memref<128xf32, #tpu.memory_space<vmem>>)
    %c11_i32_77 = arith.constant 11 : i32
    %c0_i32_78 = arith.constant 0 : i32
    %c0_i32_79 = arith.constant 0 : i32
    %158 = tpu.memref_slice %arg2[%c0_i32_78, %c0_i32_79] : memref<512x128xf32, #tpu.memory_space<any>> -> memref<1x128xf32, #tpu.memory_space<any>>
    %159 = tpu.memref_squeeze %158 : memref<1x128xf32, #tpu.memory_space<any>> -> memref<128xf32, #tpu.memory_space<any>>
    %c0_i32_80 = arith.constant 0 : i32
    %160 = tpu.memref_slice %arg3[%c11_i32_77, %c0_i32_80] : memref<16x128xf32, #tpu.memory_space<vmem>> -> memref<1x128xf32, #tpu.memory_space<vmem>>
    %161 = tpu.memref_squeeze %160 : memref<1x128xf32, #tpu.memory_space<vmem>> -> memref<128xf32, #tpu.memory_space<vmem>>
    tpu.wait_dma2 semaphore(%arg4 : memref<!tpu.dma_semaphore, #tpu.memory_space<semaphore_mem>>) src(%159 : memref<128xf32, #tpu.memory_space<any>>) dst(%161 : memref<128xf32, #tpu.memory_space<vmem>>)
    %c12_i32_81 = arith.constant 12 : i32
    %c0_i32_82 = arith.constant 0 : i32
    %c0_i32_83 = arith.constant 0 : i32
    %162 = tpu.memref_slice %arg2[%c0_i32_82, %c0_i32_83] : memref<512x128xf32, #tpu.memory_space<any>> -> memref<1x128xf32, #tpu.memory_space<any>>
    %163 = tpu.memref_squeeze %162 : memref<1x128xf32, #tpu.memory_space<any>> -> memref<128xf32, #tpu.memory_space<any>>
    %c0_i32_84 = arith.constant 0 : i32
    %164 = tpu.memref_slice %arg3[%c12_i32_81, %c0_i32_84] : memref<16x128xf32, #tpu.memory_space<vmem>> -> memref<1x128xf32, #tpu.memory_space<vmem>>
    %165 = tpu.memref_squeeze %164 : memref<1x128xf32, #tpu.memory_space<vmem>> -> memref<128xf32, #tpu.memory_space<vmem>>
    tpu.wait_dma2 semaphore(%arg4 : memref<!tpu.dma_semaphore, #tpu.memory_space<semaphore_mem>>) src(%163 : memref<128xf32, #tpu.memory_space<any>>) dst(%165 : memref<128xf32, #tpu.memory_space<vmem>>)
    %c13_i32_85 = arith.constant 13 : i32
    %c0_i32_86 = arith.constant 0 : i32
    %c0_i32_87 = arith.constant 0 : i32
    %166 = tpu.memref_slice %arg2[%c0_i32_86, %c0_i32_87] : memref<512x128xf32, #tpu.memory_space<any>> -> memref<1x128xf32, #tpu.memory_space<any>>
    %167 = tpu.memref_squeeze %166 : memref<1x128xf32, #tpu.memory_space<any>> -> memref<128xf32, #tpu.memory_space<any>>
    %c0_i32_88 = arith.constant 0 : i32
    %168 = tpu.memref_slice %arg3[%c13_i32_85, %c0_i32_88] : memref<16x128xf32, #tpu.memory_space<vmem>> -> memref<1x128xf32, #tpu.memory_space<vmem>>
    %169 = tpu.memref_squeeze %168 : memref<1x128xf32, #tpu.memory_space<vmem>> -> memref<128xf32, #tpu.memory_space<vmem>>
    tpu.wait_dma2 semaphore(%arg4 : memref<!tpu.dma_semaphore, #tpu.memory_space<semaphore_mem>>) src(%167 : memref<128xf32, #tpu.memory_space<any>>) dst(%169 : memref<128xf32, #tpu.memory_space<vmem>>)
    %c14_i32_89 = arith.constant 14 : i32
    %c0_i32_90 = arith.constant 0 : i32
    %c0_i32_91 = arith.constant 0 : i32
    %170 = tpu.memref_slice %arg2[%c0_i32_90, %c0_i32_91] : memref<512x128xf32, #tpu.memory_space<any>> -> memref<1x128xf32, #tpu.memory_space<any>>
    %171 = tpu.memref_squeeze %170 : memref<1x128xf32, #tpu.memory_space<any>> -> memref<128xf32, #tpu.memory_space<any>>
    %c0_i32_92 = arith.constant 0 : i32
    %172 = tpu.memref_slice %arg3[%c14_i32_89, %c0_i32_92] : memref<16x128xf32, #tpu.memory_space<vmem>> -> memref<1x128xf32, #tpu.memory_space<vmem>>
    %173 = tpu.memref_squeeze %172 : memref<1x128xf32, #tpu.memory_space<vmem>> -> memref<128xf32, #tpu.memory_space<vmem>>
    tpu.wait_dma2 semaphore(%arg4 : memref<!tpu.dma_semaphore, #tpu.memory_space<semaphore_mem>>) src(%171 : memref<128xf32, #tpu.memory_space<any>>) dst(%173 : memref<128xf32, #tpu.memory_space<vmem>>)
    %c15_i32_93 = arith.constant 15 : i32
    %c0_i32_94 = arith.constant 0 : i32
    %c0_i32_95 = arith.constant 0 : i32
    %174 = tpu.memref_slice %arg2[%c0_i32_94, %c0_i32_95] : memref<512x128xf32, #tpu.memory_space<any>> -> memref<1x128xf32, #tpu.memory_space<any>>
    %175 = tpu.memref_squeeze %174 : memref<1x128xf32, #tpu.memory_space<any>> -> memref<128xf32, #tpu.memory_space<any>>
    %c0_i32_96 = arith.constant 0 : i32
    %176 = tpu.memref_slice %arg3[%c15_i32_93, %c0_i32_96] : memref<16x128xf32, #tpu.memory_space<vmem>> -> memref<1x128xf32, #tpu.memory_space<vmem>>
    %177 = tpu.memref_squeeze %176 : memref<1x128xf32, #tpu.memory_space<vmem>> -> memref<128xf32, #tpu.memory_space<vmem>>
    tpu.wait_dma2 semaphore(%arg4 : memref<!tpu.dma_semaphore, #tpu.memory_space<semaphore_mem>>) src(%175 : memref<128xf32, #tpu.memory_space<any>>) dst(%177 : memref<128xf32, #tpu.memory_space<vmem>>)
    %c16_i32_97 = arith.constant 16 : i32
    return
  }
  func.func @transform_1(%arg0: i32, %arg1: memref<16xi32, #tpu.memory_space<smem>>) -> (i32, i32) {
    %c0_i32 = arith.constant 0 : i32
    %c0_i32_0 = arith.constant 0 : i32
    return %arg0, %c0_i32 : i32, i32
  }
}

</mosaic_0001>

<bundles_post_ra>
// kernel: share_embedding_lookup.1
= control target key start
LH: loop header
LB: loop body
LE: loop exit
PB: predicated region body
PF: predicated region fallthrough
CT: control target
= control target key end

     0   :  { %s820_s12 = smov [#allocation4]   ;;  %s1038_s0 = inlined_call_operand.vmem [shape: s32[16], index: 0, kind: input, shape index: {}]   ;;  %s1039_s1 = inlined_call_operand.hbm [shape: f32[512,128], index: 1, kind: input, shape index: {}]   ;;  %s1040_s2 = inlined_call_operand.hbm [shape: f32[16,128], index: 2, kind: output, shape index: {}]  }
   0x1   :  { %s8_s11 = sshll.u32 %s1038_s0, 4  ;;  %s9_s11 = int_to_ptr.vmem [resolvable:$true] %s8_s11 }
   0x2   :  { %11 = dma.vmem_to_smem %s9_s11, 16, %s820_s12, [#allocation3] }
   0x3   :  { %814 = dma.done.wait [#allocation3], 16 }
   0x4   :  { %815 = vsyncadd [#allocation3], 4294967280 }
   0x5   :  { %14 = sfence }
   0x6   :  { %15 = vsyncpa [#allocation6], 0  ;;  %s17_s13 = sld [smem:[#allocation4]]  ;;  %s821_s14 = smov [#allocation5]  }
   0x7   :  { %s857_s15 = sshll.u32 %s821_s14, 4  ;;  %s359_s16 = sld [smem:[#allocation4 + $0x1]]  ;;  %s29_s15 = int_to_ptr.vmem [resolvable:$true] %s857_s15 }
   0x8   :  { %s822_s17 = smov [#allocation5 + $0x1]   ;;  %s862_s19 = sld [smem:[#allocation4 + $0x2]] }
   0x9   :  { %s860_s18 = sshll.u32 %s822_s17, 4  ;;  %s823_s0 = smov [#allocation5 + $0x2]   ;;  %s46_s18 = int_to_ptr.vmem [resolvable:$true] %s860_s18 }
   0xa   :  { %s865_s20 = sshll.u32 %s823_s0, 4  ;;  %s867_s21 = sld [smem:[#allocation4 + $0x3]]  ;;  %s63_s20 = int_to_ptr.vmem [resolvable:$true] %s865_s20 }
   0xb   :  { %s879_s6 = scalar_lea.hbm %s1039_s1, 512 }
   0xc   :  { %s18_s24 = scalar_lea.hbm %s1039_s1, %s17_s13 }
   0xd   :  { %s26_s25 = sshll.u32 %s18_s24, 4  ;;  %s34_s28 = scalar_lea.hbm %s1039_s1, %s359_s16  ;;  %s27_s25 = int_to_ptr.hbm [resolvable:$true] %s26_s25 }
   0xe   :  { %s43_s29 = sshll.u32 %s34_s28, 4  ;;  %s406_s30 = sshra.s32 %s27_s25, 4  ;;  %s407_s30 = int_to_ptr.hbm [resolvable:$true] %s406_s30  ;;  %s44_s29 = int_to_ptr.hbm [resolvable:$true] %s43_s29 }
   0xf   :  { %s408_s3 = scalar_lea.hbm %s407_s30, 1  ;;  %p411_p1 = scmp.lt.s32.totalorder %s407_s30, %s1039_s1 }
  0x10   :  { %p409_p0 = scmp.ne.s32.totalorder %s407_s30, %s408_s3  ;;  %p412_p2 = scmp.lt.s32.totalorder %s879_s6, %s408_s3 }
  0x12   :  { %p413_p3 = por %p412_p2, %p411_p1 }
  0x14   :  { %p414_p4 = pnand %p413_p3, %p409_p0 }
  0x16   :  { %417 = shalt.err (!%p414_p4)  }
  0x17   :  { %31 = dma.hbm_to_vmem [thread:$0]  %s27_s25, 16, %s29_s15, [#allocation2] }
  0x18   :  { %s51_s11 = scalar_lea.hbm %s1039_s1, %s862_s19  ;;  %s430_s12 = sshra.s32 %s44_s29, 4  ;;  %s431_s12 = int_to_ptr.hbm [resolvable:$true] %s430_s12 }
  0x19   :  { %s432_s13 = scalar_lea.hbm %s431_s12, 1  ;;  %p435_p6 = scmp.lt.s32.totalorder %s431_s12, %s1039_s1 }
  0x1a   :  { %p433_p5 = scmp.ne.s32.totalorder %s431_s12, %s432_s13  ;;  %p436_p7 = scmp.lt.s32.totalorder %s879_s6, %s432_s13 }
  0x1c   :  { %p437_p8 = por %p436_p7, %p435_p6 }
  0x1e   :  { %p438_p9 = pnand %p437_p8, %p433_p5 }
  0x20   :  { %441 = shalt.err (!%p438_p9)  }
  0x21   :  { %48 = dma.hbm_to_vmem [thread:$0]  %s44_s29, 16, %s46_s18, [#allocation2] }
  0x22   :  { %s60_s17 = sshll.u32 %s51_s11, 4  ;;  %s68_s22 = scalar_lea.hbm %s1039_s1, %s867_s21  ;;  %s61_s17 = int_to_ptr.hbm [resolvable:$true] %s60_s17 }
  0x23   :  { %s77_s23 = sshll.u32 %s68_s22, 4  ;;  %s454_s24 = sshra.s32 %s61_s17, 4  ;;  %s455_s24 = int_to_ptr.hbm [resolvable:$true] %s454_s24  ;;  %s78_s23 = int_to_ptr.hbm [resolvable:$true] %s77_s23 }
  0x24   :  { %s456_s25 = scalar_lea.hbm %s455_s24, 1  ;;  %p459_p11 = scmp.lt.s32.totalorder %s455_s24, %s1039_s1 }
  0x25   :  { %p457_p10 = scmp.ne.s32.totalorder %s455_s24, %s456_s25  ;;  %p460_p12 = scmp.lt.s32.totalorder %s879_s6, %s456_s25 }
  0x27   :  { %p461_p13 = por %p460_p12, %p459_p11 }
  0x29   :  { %p462_p0 = pnand %p461_p13, %p457_p10 }
  0x2b   :  { %465 = shalt.err (!%p462_p0)  }
  0x2c   :  { %65 = dma.hbm_to_vmem [thread:$0]  %s61_s17, 16, %s63_s20, [#allocation2] }
  0x2d   :  { %s824_s18 = smov [#allocation5 + $0x3]   ;;  %s362_s28 = sld [smem:[#allocation4 + $0x4]] }
  0x2e   :  { %s79_s21 = sshll.u32 %s824_s18, 4  ;;  %s478_s29 = sshra.s32 %s78_s23, 4  ;;  %s80_s21 = int_to_ptr.vmem [resolvable:$true] %s79_s21  ;;  %s479_s29 = int_to_ptr.hbm [resolvable:$true] %s478_s29 }
  0x2f   :  { %s480_s30 = scalar_lea.hbm %s479_s29, 1  ;;  %p483_p2 = scmp.lt.s32.totalorder %s479_s29, %s1039_s1 }
  0x30   :  { %p481_p1 = scmp.ne.s32.totalorder %s479_s29, %s480_s30  ;;  %p484_p3 = scmp.lt.s32.totalorder %s879_s6, %s480_s30 }
  0x32   :  { %p485_p4 = por %p484_p3, %p483_p2 }
  0x34   :  { %p486_p5 = pnand %p485_p4, %p481_p1 }
  0x36   :  { %489 = shalt.err (!%p486_p5)  }
  0x37   :  { %82 = dma.hbm_to_vmem [thread:$0]  %s78_s23, 16, %s80_s21, [#allocation2] }
  0x38   :  { %s825_s5 = smov [#allocation5 + $0x4]   ;;  %s363_s7 = sld [smem:[#allocation4 + $0x5]] }
  0x39   :  { %s96_s20 = sshll.u32 %s825_s5, 4  ;;  %s826_s8 = smov [#allocation5 + $0x5]   ;;  %s97_s20 = int_to_ptr.vmem [resolvable:$true] %s96_s20 }
  0x3a   :  { %s911_s9 = sshll.u32 %s826_s8, 4  ;;  %s364_s10 = sld [smem:[#allocation4 + $0x6]]  ;;  %s114_s9 = int_to_ptr.vmem [resolvable:$true] %s911_s9 }
  0x3b   :  { %s85_s13 = scalar_lea.hbm %s1039_s1, %s362_s28  ;;  %s827_s16 = smov [#allocation5 + $0x6]  }
  0x3c   :  { %s94_s14 = sshll.u32 %s85_s13, 4  ;;  %s917_s17 = sshll.u32 %s827_s16, 4  ;;  %s95_s14 = int_to_ptr.hbm [resolvable:$true] %s94_s14  ;;  %s131_s17 = int_to_ptr.vmem [resolvable:$true] %s917_s17 }
  0x3d   :  { %s502_s0 = sshra.s32 %s95_s14, 4  ;;  %s503_s0 = int_to_ptr.hbm [resolvable:$true] %s502_s0 }
  0x3e   :  { %s504_s19 = scalar_lea.hbm %s503_s0, 1  ;;  %p507_p7 = scmp.lt.s32.totalorder %s503_s0, %s1039_s1 }
  0x3f   :  { %p505_p6 = scmp.ne.s32.totalorder %s503_s0, %s504_s19  ;;  %p508_p8 = scmp.lt.s32.totalorder %s879_s6, %s504_s19 }
  0x41   :  { %p509_p9 = por %p508_p8, %p507_p7 }
  0x43   :  { %p510_p10 = pnand %p509_p9, %p505_p6 }
  0x45   :  { %513 = shalt.err (!%p510_p10)  }
  0x46   :  { %99 = dma.hbm_to_vmem [thread:$0]  %s95_s14, 16, %s97_s20, [#allocation2] }
  0x47   :  { %s102_s26 = scalar_lea.hbm %s1039_s1, %s363_s7  ;;  %s119_s28 = scalar_lea.hbm %s1039_s1, %s364_s10 }
  0x48   :  { %s111_s27 = sshll.u32 %s102_s26, 4  ;;  %s128_s29 = sshll.u32 %s119_s28, 4  ;;  %s112_s27 = int_to_ptr.hbm [resolvable:$true] %s111_s27  ;;  %s129_s29 = int_to_ptr.hbm [resolvable:$true] %s128_s29 }
  0x49   :  { %s526_s30 = sshra.s32 %s112_s27, 4  ;;  %s527_s30 = int_to_ptr.hbm [resolvable:$true] %s526_s30 }
  0x4a   :  { %s528_s3 = scalar_lea.hbm %s527_s30, 1  ;;  %p531_p12 = scmp.lt.s32.totalorder %s527_s30, %s1039_s1 }
  0x4b   :  { %p529_p11 = scmp.ne.s32.totalorder %s527_s30, %s528_s3  ;;  %p532_p13 = scmp.lt.s32.totalorder %s879_s6, %s528_s3 }
  0x4d   :  { %p533_p0 = por %p532_p13, %p531_p12 }
  0x4f   :  { %p534_p1 = pnand %p533_p0, %p529_p11 }
  0x51   :  { %537 = shalt.err (!%p534_p1)  }
  0x52   :  { %116 = dma.hbm_to_vmem [thread:$0]  %s112_s27, 16, %s114_s9, [#allocation2] }
  0x53   :  { %s365_s20 = sld [smem:[#allocation4 + $0x7]]  ;;  %s550_s7 = sshra.s32 %s129_s29, 4  ;;  %s551_s7 = int_to_ptr.hbm [resolvable:$true] %s550_s7 }
  0x54   :  { %s552_s8 = scalar_lea.hbm %s551_s7, 1  ;;  %p555_p3 = scmp.lt.s32.totalorder %s551_s7, %s1039_s1 }
  0x55   :  { %p553_p2 = scmp.ne.s32.totalorder %s551_s7, %s552_s8  ;;  %p556_p4 = scmp.lt.s32.totalorder %s879_s6, %s552_s8 }
  0x57   :  { %p557_p5 = por %p556_p4, %p555_p3 }
  0x59   :  { %p558_p6 = pnand %p557_p5, %p553_p2 }
  0x5b   :  { %561 = shalt.err (!%p558_p6)  }
  0x5c   :  { %133 = dma.hbm_to_vmem [thread:$0]  %s129_s29, 16, %s131_s17, [#allocation2] }
  0x5d   :  { %s366_s12 = sld [smem:[#allocation4 + $0x8]]  ;;  %s828_s13 = smov [#allocation5 + $0x7]  }
  0x5e   :  { %s147_s14 = sshll.u32 %s828_s13, 4  ;;  %s829_s9 = smov [#allocation5 + $0x8]   ;;  %s148_s14 = int_to_ptr.vmem [resolvable:$true] %s147_s14 }
  0x5f   :  { %s940_s16 = sshll.u32 %s829_s9, 4  ;;  %s943_s0 = sld [smem:[#allocation4 + $0x9]]  ;;  %s165_s16 = int_to_ptr.vmem [resolvable:$true] %s940_s16 }
  0x60   :  { %s136_s23 = scalar_lea.hbm %s1039_s1, %s365_s20  ;;  %s830_s25 = smov [#allocation5 + $0x9]  }
  0x61   :  { %s145_s24 = sshll.u32 %s136_s23, 4  ;;  %s948_s26 = sshll.u32 %s830_s25, 4  ;;  %s146_s24 = int_to_ptr.hbm [resolvable:$true] %s145_s24  ;;  %s182_s26 = int_to_ptr.vmem [resolvable:$true] %s948_s26 }
  0x62   :  { %s574_s21 = sshra.s32 %s146_s24, 4  ;;  %s575_s21 = int_to_ptr.hbm [resolvable:$true] %s574_s21 }
  0x63   :  { %s153_s18 = scalar_lea.hbm %s1039_s1, %s366_s12  ;;  %s576_s28 = scalar_lea.hbm %s575_s21, 1 }
  0x64   :  { %p577_p7 = scmp.ne.s32.totalorder %s575_s21, %s576_s28  ;;  %p579_p8 = scmp.lt.s32.totalorder %s575_s21, %s1039_s1 }
  0x65   :  { %p580_p9 = scmp.lt.s32.totalorder %s879_s6, %s576_s28 }
  0x67   :  { %p581_p10 = por %p580_p9, %p579_p8 }
  0x69   :  { %p582_p11 = pnand %p581_p10, %p577_p7 }
  0x6b   :  { %585 = shalt.err (!%p582_p11)  }
  0x6c   :  { %150 = dma.hbm_to_vmem [thread:$0]  %s146_s24, 16, %s148_s14, [#allocation2] }
  0x6d   :  { %s162_s3 = sshll.u32 %s153_s18, 4  ;;  %s170_s20 = scalar_lea.hbm %s1039_s1, %s943_s0  ;;  %s163_s3 = int_to_ptr.hbm [resolvable:$true] %s162_s3 }
  0x6e   :  { %s598_s7 = sshra.s32 %s163_s3, 4  ;;  %s599_s7 = int_to_ptr.hbm [resolvable:$true] %s598_s7 }
  0x6f   :  { %s600_s8 = scalar_lea.hbm %s599_s7, 1  ;;  %p603_p13 = scmp.lt.s32.totalorder %s599_s7, %s1039_s1 }
  0x70   :  { %p601_p12 = scmp.ne.s32.totalorder %s599_s7, %s600_s8  ;;  %p604_p0 = scmp.lt.s32.totalorder %s879_s6, %s600_s8 }
  0x72   :  { %p605_p1 = por %p604_p0, %p603_p13 }
  0x74   :  { %p606_p2 = pnand %p605_p1, %p601_p12 }
  0x76   :  { %609 = shalt.err (!%p606_p2)  }
  0x77   :  { %167 = dma.hbm_to_vmem [thread:$0]  %s163_s3, 16, %s165_s16, [#allocation2] }
  0x78   :  { %s179_s12 = sshll.u32 %s170_s20, 4  ;;  %s368_s13 = sld [smem:[#allocation4 + $0xa]]  ;;  %s180_s12 = int_to_ptr.hbm [resolvable:$true] %s179_s12 }
  0x79   :  { %s622_s14 = sshra.s32 %s180_s12, 4  ;;  %s623_s14 = int_to_ptr.hbm [resolvable:$true] %s622_s14 }
  0x7a   :  { %s624_s9 = scalar_lea.hbm %s623_s14, 1  ;;  %p627_p4 = scmp.lt.s32.totalorder %s623_s14, %s1039_s1 }
  0x7b   :  { %p625_p3 = scmp.ne.s32.totalorder %s623_s14, %s624_s9  ;;  %p628_p5 = scmp.lt.s32.totalorder %s879_s6, %s624_s9 }
  0x7d   :  { %p629_p6 = por %p628_p5, %p627_p4 }
  0x7f   :  { %p630_p7 = pnand %p629_p6, %p625_p3 }
  0x81   :  { %633 = shalt.err (!%p630_p7)  }
  0x82   :  { %184 = dma.hbm_to_vmem [thread:$0]  %s180_s12, 16, %s182_s26, [#allocation2] }
  0x83   :  { %s831_s22 = smov [#allocation5 + $0xa]   ;;  %s369_s24 = sld [smem:[#allocation4 + $0xb]] }
  0x84   :  { %s198_s23 = sshll.u32 %s831_s22, 4  ;;  %s832_s16 = smov [#allocation5 + $0xb]   ;;  %s199_s23 = int_to_ptr.vmem [resolvable:$true] %s198_s23 }
  0x85   :  { %s972_s25 = sshll.u32 %s832_s16, 4  ;;  %s370_s17 = sld [smem:[#allocation4 + $0xc]]  ;;  %s216_s25 = int_to_ptr.vmem [resolvable:$true] %s972_s25 }
  0x86   :  { %s187_s21 = scalar_lea.hbm %s1039_s1, %s368_s13  ;;  %s833_s29 = smov [#allocation5 + $0xc]  }
  0x87   :  { %s196_s28 = sshll.u32 %s187_s21, 4  ;;  %s978_s30 = sshll.u32 %s833_s29, 4  ;;  %s197_s28 = int_to_ptr.hbm [resolvable:$true] %s196_s28  ;;  %s233_s30 = int_to_ptr.vmem [resolvable:$true] %s978_s30 }
  0x88   :  { %s646_s26 = sshra.s32 %s197_s28, 4  ;;  %s647_s26 = int_to_ptr.hbm [resolvable:$true] %s646_s26 }
  0x89   :  { %s648_s3 = scalar_lea.hbm %s647_s26, 1  ;;  %p651_p9 = scmp.lt.s32.totalorder %s647_s26, %s1039_s1 }
  0x8a   :  { %p649_p8 = scmp.ne.s32.totalorder %s647_s26, %s648_s3  ;;  %p652_p10 = scmp.lt.s32.totalorder %s879_s6, %s648_s3 }
  0x8c   :  { %p653_p11 = por %p652_p10, %p651_p9 }
  0x8e   :  { %p654_p12 = pnand %p653_p11, %p649_p8 }
  0x90   :  { %657 = shalt.err (!%p654_p12)  }
  0x91   :  { %201 = dma.hbm_to_vmem [thread:$0]  %s197_s28, 16, %s199_s23, [#allocation2] }
  0x92   :  { %s204_s8 = scalar_lea.hbm %s1039_s1, %s369_s24  ;;  %s221_s13 = scalar_lea.hbm %s1039_s1, %s370_s17 }
  0x93   :  { %s213_s10 = sshll.u32 %s204_s8, 4  ;;  %s230_s14 = sshll.u32 %s221_s13, 4  ;;  %s214_s10 = int_to_ptr.hbm [resolvable:$true] %s213_s10  ;;  %s231_s14 = int_to_ptr.hbm [resolvable:$true] %s230_s14 }
  0x94   :  { %s670_s9 = sshra.s32 %s214_s10, 4  ;;  %s671_s9 = int_to_ptr.hbm [resolvable:$true] %s670_s9 }
  0x95   :  { %s672_s0 = scalar_lea.hbm %s671_s9, 1  ;;  %p675_p0 = scmp.lt.s32.totalorder %s671_s9, %s1039_s1 }
  0x96   :  { %p673_p13 = scmp.ne.s32.totalorder %s671_s9, %s672_s0  ;;  %p676_p1 = scmp.lt.s32.totalorder %s879_s6, %s672_s0 }
  0x98   :  { %p677_p2 = por %p676_p1, %p675_p0 }
  0x9a   :  { %p678_p3 = pnand %p677_p2, %p673_p13 }
  0x9c   :  { %681 = shalt.err (!%p678_p3)  }
  0x9d   :  { %218 = dma.hbm_to_vmem [thread:$0]  %s214_s10, 16, %s216_s25, [#allocation2] }
  0x9e   :  { %s371_s23 = sld [smem:[#allocation4 + $0xd]]  ;;  %s694_s24 = sshra.s32 %s231_s14, 4  ;;  %s695_s24 = int_to_ptr.hbm [resolvable:$true] %s694_s24 }
  0x9f   :  { %s696_s16 = scalar_lea.hbm %s695_s24, 1  ;;  %p699_p5 = scmp.lt.s32.totalorder %s695_s24, %s1039_s1 }
  0xa0   :  { %p697_p4 = scmp.ne.s32.totalorder %s695_s24, %s696_s16  ;;  %p700_p6 = scmp.lt.s32.totalorder %s879_s6, %s696_s16 }
  0xa2   :  { %p701_p7 = por %p700_p6, %p699_p5 }
  0xa4   :  { %p702_p8 = pnand %p701_p7, %p697_p4 }
  0xa6   :  { %705 = shalt.err (!%p702_p8)  }
  0xa7   :  { %235 = dma.hbm_to_vmem [thread:$0]  %s231_s14, 16, %s233_s30, [#allocation2] }
  0xa8   :  { %s372_s18 = sld [smem:[#allocation4 + $0xe]]  ;;  %s834_s21 = smov [#allocation5 + $0xd]  }
  0xa9   :  { %s249_s28 = sshll.u32 %s834_s21, 4  ;;  %s835_s25 = smov [#allocation5 + $0xe]   ;;  %s250_s28 = int_to_ptr.vmem [resolvable:$true] %s249_s28 }
  0xaa   :  { %s1001_s29 = sshll.u32 %s835_s25, 4  ;;  %s1004_s26 = sld [smem:[#allocation4 + $0xf]]  ;;  %s267_s29 = int_to_ptr.vmem [resolvable:$true] %s1001_s29 }
  0xab   :  { %s238_s5 = scalar_lea.hbm %s1039_s1, %s371_s23  ;;  %s836_s7 = smov [#allocation5 + $0xf]  }
  0xac   :  { %s247_s20 = sshll.u32 %s238_s5, 4  ;;  %s1009_s8 = sshll.u32 %s836_s7, 4  ;;  %s248_s20 = int_to_ptr.hbm [resolvable:$true] %s247_s20  ;;  %s284_s8 = int_to_ptr.vmem [resolvable:$true] %s1009_s8 }
  0xad   :  { %s718_s12 = sshra.s32 %s248_s20, 4  ;;  %s719_s12 = int_to_ptr.hbm [resolvable:$true] %s718_s12 }
  0xae   :  { %s255_s11 = scalar_lea.hbm %s1039_s1, %s372_s18  ;;  %s720_s13 = scalar_lea.hbm %s719_s12, 1 }
  0xaf   :  { %p721_p9 = scmp.ne.s32.totalorder %s719_s12, %s720_s13  ;;  %p723_p10 = scmp.lt.s32.totalorder %s719_s12, %s1039_s1 }
  0xb0   :  { %p724_p11 = scmp.lt.s32.totalorder %s879_s6, %s720_s13 }
  0xb2   :  { %p725_p12 = por %p724_p11, %p723_p10 }
  0xb4   :  { %p726_p13 = pnand %p725_p12, %p721_p9 }
  0xb6   :  { %729 = shalt.err (!%p726_p13)  }
  0xb7   :  { %252 = dma.hbm_to_vmem [thread:$0]  %s248_s20, 16, %s250_s28, [#allocation2] }
  0xb8   :  { %s264_s0 = sshll.u32 %s255_s11, 4  ;;  %s272_s23 = scalar_lea.hbm %s1039_s1, %s1004_s26  ;;  %s265_s0 = int_to_ptr.hbm [resolvable:$true] %s264_s0 }
  0xb9   :  { %s742_s24 = sshra.s32 %s265_s0, 4  ;;  %s743_s24 = int_to_ptr.hbm [resolvable:$true] %s742_s24 }
  0xba   :  { %s744_s16 = scalar_lea.hbm %s743_s24, 1  ;;  %p747_p1 = scmp.lt.s32.totalorder %s743_s24, %s1039_s1 }
  0xbb   :  { %p745_p0 = scmp.ne.s32.totalorder %s743_s24, %s744_s16  ;;  %p748_p2 = scmp.lt.s32.totalorder %s879_s6, %s744_s16 }
  0xbd   :  { %p749_p3 = por %p748_p2, %p747_p1 }
  0xbf   :  { %p750_p4 = pnand %p749_p3, %p745_p0 }
  0xc1   :  { %753 = shalt.err (!%p750_p4)  }
  0xc2   :  { %269 = dma.hbm_to_vmem [thread:$0]  %s265_s0, 16, %s267_s29, [#allocation2] }
  0xc3   :  { %s281_s18 = sshll.u32 %s272_s23, 4  ;;  %s282_s18 = int_to_ptr.hbm [resolvable:$true] %s281_s18 }
  0xc4   :  { %s766_s21 = sshra.s32 %s282_s18, 4  ;;  %s767_s21 = int_to_ptr.hbm [resolvable:$true] %s766_s21 }
  0xc5   :  { %s768_s28 = scalar_lea.hbm %s767_s21, 1  ;;  %p771_p6 = scmp.lt.s32.totalorder %s767_s21, %s1039_s1 }
  0xc6   :  { %p769_p5 = scmp.ne.s32.totalorder %s767_s21, %s768_s28  ;;  %p772_p7 = scmp.lt.s32.totalorder %s879_s6, %s768_s28 }
  0xc8   :  { %p773_p8 = por %p772_p7, %p771_p6 }
  0xca   :  { %p774_p9 = pnand %p773_p8, %p769_p5 }
  0xcc   :  { %777 = shalt.err (!%p774_p9)  }
  0xcd   :  { %286 = dma.hbm_to_vmem [thread:$0]  %s282_s18, 16, %s284_s8, [#allocation2] }
  0xce   :  { %816 = dma.done.wait [#allocation2], 256 }
  0xcf   :  { %817 = vsyncadd [#allocation2], 4294967040  ;;  %s325_s29 = sshll.u32 %s1040_s2, 4  ;;  %s837_s5 = smov 128   ;;  %s326_s29 = int_to_ptr.hbm [resolvable:$true] %s325_s29 }
  0xd0   :  { %s838_s20 = smov 8  }
  0xd1   :  { %331 = dma.vmem_to_hbm [thread:$0]  %s29_s15, 256, %s326_s29, [#allocation6], %s837_s5, %s837_s5, %s838_s20  }
  0xd2   :  { %818 = dma.done.wait [#allocation6], 256  }
  0xd3   :  { %819 = vsyncadd [#allocation6], 4294967040 }
  0xd4   :  { %336 = vsyncpa [#allocation6], 1 }
  0xd5   :  { %337 = vsyncmov [#allocation2] }
  0xd8   :  { %s338_s1 = vpop.sfrf %337 }
  0xd9   :  { %p374_p10 = scmp.ne.s32.totalorder %s338_s1, 0 }
  0xdb   :  { %342 = shalt.err (%p374_p10)  }

</bundles_post_ra>
